<compile_context>
chip_gen: v5e
topology: v5e:2x2
jax: 0.10.0
libtpu: 0.0.40
codegen_flags: <defaults>
</compile_context>

<pallas_src>
import jax
import jax.numpy as jnp
from jax import lax
from jax.experimental import pallas as pl
from jax.experimental.pallas import tpu as pltpu

# Module "parameters" (deterministic, from __init__ signature)
IGNORE_INDEX = -100
LABEL_SMOOTHING = 0.1
LOSS_WEIGHT = 1.0  # stored by the module but NOT applied in forward (matches reference)


def _ce_kernel(logits_ref, labels_ref, sum_ref, cnt_ref):
    """One (C, T) slab: smoothed CE; writes per-tile partial loss-sum & valid-count."""
    x = logits_ref[0].astype(jnp.float32)   # (C, T)  class on sublanes, spatial on lanes
    y = labels_ref[0]                       # (1, T)  int32
    c, t = x.shape

    # numerically stable log-sum-exp over the class (sublane) axis
    m = jnp.max(x, axis=0, keepdims=True)                               # (1, T)
    lse = m + jnp.log(jnp.sum(jnp.exp(x - m), axis=0, keepdims=True))   # (1, T)

    # gather x[y] via one-hot compare against a sublane iota; logp never materialized:
    #   nll    = lse - x[y]
    #   smooth = lse - mean_c(x)
    onehot = lax.broadcasted_iota(jnp.int32, (c, t), 0) == y            # (C, T)
    x_y = jnp.sum(jnp.where(onehot, x, 0.0), axis=0, keepdims=True)     # (1, T)
    sum_x = jnp.sum(x, axis=0, keepdims=True)                           # (1, T)

    nll = lse - x_y
    smooth = lse - sum_x * (1.0 / c)

    loss = (1.0 - LABEL_SMOOTHING) * nll + LABEL_SMOOTHING * smooth     # (1, T)
    valid = y != IGNORE_INDEX
    loss = jnp.where(valid, loss, 0.0)

    sum_ref[...] = jnp.sum(loss).reshape(1, 1, 1, 1)
    cnt_ref[...] = jnp.sum(valid.astype(jnp.int32)).reshape(1, 1, 1, 1)


def cross_entropy_loss(logits, labels, *, tile_hw=131072):
    """Forward of the CrossEntropyLoss module. Returns dict(ce_loss=scalar).

    tile_hw=128K spatial elems -> ~2 MiB f32 logits + 0.5 MiB labels per buffer
    (double-buffered ~5 MiB), comfortably under the 32 MiB scoped-VMEM cap on
    v5e/v6e/v7x while keeping per-step DMA well above the grid-step overhead.
    Logits may be bf16 in HBM (halves bandwidth); they are upcast in-kernel.
    """
    b, c, h, w = logits.shape
    hw = h * w

    x = logits.reshape(b, c, hw)                      # free reshape (contiguous NCHW)
    y = labels.reshape(b, 1, hw).astype(jnp.int32)

    # lane-aligned spatial tile, capped at tile_hw; pad spatial axis to a multiple.
    t = min(tile_hw, pl.cdiv(hw, 128) * 128)
    hw_pad = pl.cdiv(hw, t) * t
    if hw_pad != hw:
        # padded labels get ignore_index so they are masked out
        x = jnp.pad(x, ((0, 0), (0, 0), (0, hw_pad - hw)))
        y = jnp.pad(y, ((0, 0), (0, 0), (0, hw_pad - hw)),
                    constant_values=IGNORE_INDEX)
    n_tiles = hw_pad // t

    psum, pcnt = pl.pallas_call(
        _ce_kernel,
        out_shape=(
            jax.ShapeDtypeStruct((b, n_tiles, 1, 1), jnp.float32),
            jax.ShapeDtypeStruct((b, n_tiles, 1, 1), jnp.int32),
        ),
        grid_spec=pltpu.PrefetchScalarGridSpec(
            num_scalar_prefetch=0,
            grid=(b, n_tiles),
            in_specs=[
                pl.BlockSpec((1, c, t), lambda bi, ti: (bi, 0, ti)),
                pl.BlockSpec((1, 1, t), lambda bi, ti: (bi, 0, ti)),
            ],
            out_specs=(
                pl.BlockSpec((1, 1, 1, 1), lambda bi, ti: (bi, ti, 0, 0)),
                pl.BlockSpec((1, 1, 1, 1), lambda bi, ti: (bi, ti, 0, 0)),
            ),
        ),
        compiler_params=pltpu.CompilerParams(
            dimension_semantics=("parallel", "parallel"),
            vmem_limit_bytes=32 * 1024 * 1024,
        ),
    )(x, y)

    # reduction='mean' over non-ignored elements (0/0 -> NaN, matching PyTorch)
    ce = jnp.sum(psum) / jnp.sum(pcnt).astype(jnp.float32)
    return dict(ce_loss=ce)


def _reference(logits, labels):
    """Pure-JAX reference mirroring torch.nn.CrossEntropyLoss semantics."""
    b, c, h, w = logits.shape
    x = jnp.transpose(logits, (0, 2, 3, 1)).reshape(-1, c).astype(jnp.float32)
    y = labels.reshape(-1).astype(jnp.int32)
    logp = jax.nn.log_softmax(x, axis=-1)
    nll = -jnp.take_along_axis(logp, jnp.clip(y, 0, c - 1)[:, None], axis=-1)[:, 0]
    smooth = -jnp.mean(logp, axis=-1)
    per = (1.0 - LABEL_SMOOTHING) * nll + LABEL_SMOOTHING * smooth
    valid = y != IGNORE_INDEX
    per = jnp.where(valid, per, 0.0)
    return jnp.sum(per) / jnp.sum(valid.astype(jnp.float32))


if __name__ == "__main__":
    key = jax.random.PRNGKey(0)
    k1, k2, k3 = jax.random.split(key, 3)

    B, C, H, W = 2, 4, 16, 16
    logits = jax.random.normal(k1, (B, C, H, W), dtype=jnp.float32)
    labels = jax.random.randint(k2, (B, H, W), 0, C, dtype=jnp.int32)
    # sprinkle some ignored positions to exercise ignore_index masking
    ignore_mask = jax.random.bernoulli(k3, 0.1, (B, H, W))
    labels = jnp.where(ignore_mask, IGNORE_INDEX, labels)

    out = cross_entropy_loss(logits, labels)
    ce = jax.block_until_ready(out["ce_loss"])

    ref = jax.block_until_ready(_reference(logits, labels))
    assert jnp.allclose(ce, ref, rtol=1e-5, atol=1e-5), (ce, ref)

    print("KERNEL_OK")
</pallas_src>

<mosaic_0001>
module attributes {stable_mosaic.version = 11 : i64} {
  func.func @_ce_kernel(%arg0: i32, %arg1: i32, %arg2: memref<1x4x256xf32, #tpu.memory_space<vmem>>, %arg3: memref<1x1x256xi32, #tpu.memory_space<vmem>>, %arg4: memref<1x1x1x1xf32, #tpu.memory_space<vmem>>, %arg5: memref<1x1x1x1xi32, #tpu.memory_space<vmem>>) attributes {dimension_semantics = [#tpu.dimension_semantics<parallel>, #tpu.dimension_semantics<parallel>], iteration_bounds = array<i64: 2, 1>, scalar_prefetch = 0 : i64, scratch_operands = 0 : i64, tpu.core_type = #tpu.core_type<tc>, window_params = [{transform_indices = @transform_0, window_bounds = array<i64: 1, 4, 256>}, {transform_indices = @transform_1, window_bounds = array<i64: 1, 1, 256>}, {transform_indices = @transform_2, window_bounds = array<i64: 1, 1, 1, 1>}, {transform_indices = @transform_3, window_bounds = array<i64: 1, 1, 1, 1>}]} {
    %c0 = arith.constant 0 : index
    %c0_0 = arith.constant 0 : index
    %c0_1 = arith.constant 0 : index
    %0 = vector.load %arg2[%c0, %c0_0, %c0_1] : memref<1x4x256xf32, #tpu.memory_space<vmem>>, vector<1x4x256xf32>
    %1 = vector.shape_cast %0 : vector<1x4x256xf32> to vector<4x256xf32>
    %c0_2 = arith.constant 0 : index
    %c0_3 = arith.constant 0 : index
    %c0_4 = arith.constant 0 : index
    %2 = vector.load %arg3[%c0_2, %c0_3, %c0_4] : memref<1x1x256xi32, #tpu.memory_space<vmem>>, vector<1x1x256xi32>
    %3 = vector.shape_cast %2 : vector<1x1x256xi32> to vector<1x256xi32>
    %cst = arith.constant dense<0xFF800000> : vector<256xf32>
    %4 = vector.multi_reduction <maximumf>, %1, %cst [0] : vector<4x256xf32> to vector<256xf32>
    %5 = vector.shape_cast %4 : vector<256xf32> to vector<1x256xf32>
    %6 = vector.broadcast %5 : vector<1x256xf32> to vector<4x256xf32>
    %7 = arith.subf %1, %6 : vector<4x256xf32>
    %8 = math.exp %7 : vector<4x256xf32>
    %cst_5 = arith.constant dense<0.000000e+00> : vector<256xf32>
    %9 = vector.multi_reduction <add>, %8, %cst_5 [0] : vector<4x256xf32> to vector<256xf32>
    %10 = vector.shape_cast %9 : vector<256xf32> to vector<1x256xf32>
    %11 = math.log %10 : vector<1x256xf32>
    %12 = arith.addf %5, %11 : vector<1x256xf32>
    %13 = tpu.iota {dimensions = array<i32: 0>} : vector<4x256xi32>
    %14 = vector.broadcast %3 : vector<1x256xi32> to vector<4x256xi32>
    %15 = arith.cmpi eq, %13, %14 : vector<4x256xi32>
    %cst_6 = arith.constant 0.000000e+00 : f32
    %16 = vector.broadcast %cst_6 : f32 to vector<4x256xf32>
    %17 = arith.select %15, %1, %16 : vector<4x256xi1>, vector<4x256xf32>
    %cst_7 = arith.constant dense<0.000000e+00> : vector<256xf32>
    %18 = vector.multi_reduction <add>, %17, %cst_7 [0] : vector<4x256xf32> to vector<256xf32>
    %19 = vector.shape_cast %18 : vector<256xf32> to vector<1x256xf32>
    %cst_8 = arith.constant dense<0.000000e+00> : vector<256xf32>
    %20 = vector.multi_reduction <add>, %1, %cst_8 [0] : vector<4x256xf32> to vector<256xf32>
    %21 = vector.shape_cast %20 : vector<256xf32> to vector<1x256xf32>
    %22 = arith.subf %12, %19 : vector<1x256xf32>
    %cst_9 = arith.constant 2.500000e-01 : f32
    %23 = vector.broadcast %cst_9 : f32 to vector<1x256xf32>
    %24 = arith.mulf %21, %23 : vector<1x256xf32>
    %25 = arith.subf %12, %24 : vector<1x256xf32>
    %cst_10 = arith.constant 0.899999976 : f32
    %26 = vector.broadcast %cst_10 : f32 to vector<1x256xf32>
    %27 = arith.mulf %26, %22 : vector<1x256xf32>
    %cst_11 = arith.constant 1.000000e-01 : f32
    %28 = vector.broadcast %cst_11 : f32 to vector<1x256xf32>
    %29 = arith.mulf %28, %25 : vector<1x256xf32>
    %30 = arith.addf %27, %29 : vector<1x256xf32>
    %c-100_i32 = arith.constant -100 : i32
    %31 = vector.broadcast %c-100_i32 : i32 to vector<1x256xi32>
    %32 = arith.cmpi ne, %3, %31 : vector<1x256xi32>
    %cst_12 = arith.constant 0.000000e+00 : f32
    %33 = vector.broadcast %cst_12 : f32 to vector<1x256xf32>
    %34 = arith.select %32, %30, %33 : vector<1x256xi1>, vector<1x256xf32>
    %35 = vector.shape_cast %34 : vector<1x256xf32> to vector<1x1x256xf32>
    %cst_13 = arith.constant dense<0.000000e+00> : vector<1xf32>
    %36 = vector.multi_reduction <add>, %35, %cst_13 [1, 2] : vector<1x1x256xf32> to vector<1xf32>
    %37 = vector.shape_cast %36 : vector<1xf32> to vector<1x1x1xf32>
    %38 = vector.extract %37[0, 0, 0] : f32 from vector<1x1x1xf32>
    %39 = vector.broadcast %38 : f32 to vector<1x1x1x1xf32>
    %c0_14 = arith.constant 0 : index
    %c0_15 = arith.constant 0 : index
    %c0_16 = arith.constant 0 : index
    %c0_17 = arith.constant 0 : index
    %40 = vector.load %arg4[%c0_14, %c0_15, %c0_16, %c0_17] : memref<1x1x1x1xf32, #tpu.memory_space<vmem>>, vector<1x1x1x1xf32>
    tpu.vector_store %arg4[%c0_14, %c0_15, %c0_16, %c0_17], %39 {strides = array<i32>} : memref<1x1x1x1xf32, #tpu.memory_space<vmem>>, vector<1x1x1x1xf32>,
    %41 = arith.extui %32 : vector<1x256xi1> to vector<1x256xi32>
    %42 = vector.shape_cast %41 : vector<1x256xi32> to vector<1x1x256xi32>
    %cst_18 = arith.constant dense<0> : vector<1xi32>
    %43 = vector.multi_reduction <add>, %42, %cst_18 [1, 2] : vector<1x1x256xi32> to vector<1xi32>
    %44 = vector.shape_cast %43 : vector<1xi32> to vector<1x1x1xi32>
    %45 = vector.extract %44[0, 0, 0] : i32 from vector<1x1x1xi32>
    %46 = vector.broadcast %45 : i32 to vector<1x1x1x1xi32>
    %c0_19 = arith.constant 0 : index
    %c0_20 = arith.constant 0 : index
    %c0_21 = arith.constant 0 : index
    %c0_22 = arith.constant 0 : index
    %47 = vector.load %arg5[%c0_19, %c0_20, %c0_21, %c0_22] : memref<1x1x1x1xi32, #tpu.memory_space<vmem>>, vector<1x1x1x1xi32>
    tpu.vector_store %arg5[%c0_19, %c0_20, %c0_21, %c0_22], %46 {strides = array<i32>} : memref<1x1x1x1xi32, #tpu.memory_space<vmem>>, vector<1x1x1x1xi32>,
    return
  }
  func.func @transform_0(%arg0: i32, %arg1: i32) -> (i32, i32, i32) {
    %c0_i32 = arith.constant 0 : i32
    %c0_i32_0 = arith.constant 0 : i32
    return %arg0, %c0_i32, %arg1 : i32, i32, i32
  }
  func.func @transform_1(%arg0: i32, %arg1: i32) -> (i32, i32, i32) {
    %c0_i32 = arith.constant 0 : i32
    %c0_i32_0 = arith.constant 0 : i32
    return %arg0, %c0_i32, %arg1 : i32, i32, i32
  }
  func.func @transform_2(%arg0: i32, %arg1: i32) -> (i32, i32, i32, i32) {
    %c0_i32 = arith.constant 0 : i32
    %c0_i32_0 = arith.constant 0 : i32
    %c0_i32_1 = arith.constant 0 : i32
    return %arg0, %arg1, %c0_i32, %c0_i32_0 : i32, i32, i32, i32
  }
  func.func @transform_3(%arg0: i32, %arg1: i32) -> (i32, i32, i32, i32) {
    %c0_i32 = arith.constant 0 : i32
    %c0_i32_0 = arith.constant 0 : i32
    %c0_i32_1 = arith.constant 0 : i32
    return %arg0, %arg1, %c0_i32, %c0_i32_0 : i32, i32, i32, i32
  }
}

</mosaic_0001>

<bundles_post_ra>
// kernel: tpu_custom_call.1
= control target key start
LH: loop header
LB: loop body
LE: loop exit
PB: predicated region body
PF: predicated region fallthrough
CT: control target
= control target key end

     0   :  { %9 = vsyncpa [#allocation3], 0  ;;  %s950_s0 = inlined_call_operand.hbm [shape: f32[2,4,256], index: 0, kind: input, shape index: {}]   ;;  %s951_s1 = inlined_call_operand.hbm [shape: s32[2,1,256], index: 1, kind: input, shape index: {}]   ;;  %s952_s2 = inlined_call_operand.vmem [shape: f32[2,1,1,1], index: 2, kind: output, shape index: {0}]   ;;  %s953_s3 = inlined_call_operand.vmem [shape: s32[2,1,1,1], index: 3, kind: output, shape index: {1}]  }
   0x1   :  { %11 = vsyncpa [#allocation3 + $0x1], 0 }
   0x2   :  { %12 = vsyncpa [#allocation5], 0 }
   0x3   :  { %14 = vsyncpa [#allocation5 + $0x1], 0  ;;  %s806_s12 = smov 0   ;;  %s808_s13 = smov 0  }
   0x4   :  { %s810_s14 = smov 0   ;;  %s812_s15 = smov 0  }
   0x5   :  { %s814_s16 = smov 0   ;;  %s816_s17 = smov 0  }
   0x6 LB: > { %s583_s18 = sadd.s32 4294967295, %s783_s17   ;;  %s32_s19 = sadd.s32 1, %s779_s16  ;;  %s783_s17 = sphi %s816_s17, %s20_s17   ;;  %s779_s16 = sphi %s814_s16, %s961_s16   ;;  %s775_s15 = sphi %s812_s15, %s960_s15   ;;  %s771_s14 = sphi %s810_s14, %s959_s14   ;;  %s767_s13 = sphi %s808_s13, %s958_s13   ;;  %s763_s12 = sphi %s806_s12, %s957_s12  }
   0x7   : > { %p34_p0 = scmp.ge.s32.totalorder %s32_s19, 2  ;;  %s41_s20 = sadd.s32 1, %s771_s14 }
   0x8   : > { %p48_p1 = scmp.ne.s32.totalorder %s771_s14, %s767_s13  ;;  %p49_p2 = scmp.eq.s32.totalorder %s783_s17, 0 }
   0x9   : > { %s963_s19 = smov (%p34_p0, %s32_s19), 0  ;;  %p54_p4 = scmp.ne.s32.totalorder %s767_s13, %s763_s12 }
   0xa   : > { %p842_p3 = por %p49_p2, %p48_p1  ;;  %s36_s22 = ssub.s32 %s779_s16, %s963_s19 }
   0xb   : > { %p55_p5 = scmp.eq.s32.totalorder %s583_s18, 0  ;;  %p39_p6 = scmp.eq.s32.totalorder %s36_s22, 0 }
   0xc   : > { %p613_p8 = scmp.lt.s32.totalorder %s783_s17, 2  ;;  %s162_s25 = sand.u32 1, %s771_s14  }
   0xd   : > { %p849_p7 = por %p55_p5, %p54_p4  ;;  %s597_s26 = sshll.u32 %s779_s16, 3 }
   0xe   : > { %s855_s24 = scalar_select %p39_p6, %s771_s14, %s41_s20  }
   0xf   : > { %s587_s27 = sshll.u32 %s162_s25, 3  ;;  %s173_s30 = scalar_lea.hbm %s950_s0, %s597_s26 }
  0x10   : > { %s175_s4 = sshll.u32 %s173_s30, 4  ;;  %s166_s5 = scalar_lea.vmem [#allocation2], %s587_s27  ;;  %s176_s4 = int_to_ptr.hbm [resolvable:$true] %s175_s4 }
  0x11   : > { %s177_s6 = sshll.u32 %s166_s5, 4  ;;  %p864_p9 = pnand %p613_p8, %p842_p3  ;;  %s178_s6 = int_to_ptr.vmem [resolvable:$true] %s177_s6 }
  0x12   : > { %p592_p10 = scmp.ge.s32.totalorder %s783_s17, 1  ;;  %p203_p11 = scmp.lt.s32.totalorder %s783_s17, 3 }
  0x13   : > { %s590_s8 = sshll.u32 %s162_s25, 1  ;;  %s163_s9 = scalar_lea.sflag [#allocation3], %s162_s25 }
  0x14   : > { %609 = dma.hbm_to_vmem [thread:$0]  (!%p864_p9), %s176_s4, 128, %s178_s6, %s163_s9  }
  0x15   : > { %p204_p12 = pnand %p592_p10, %p203_p11  ;;  %s591_s10 = sshll.u32 %s779_s16, 1 }
  0x16   : > { %s188_s11 = scalar_lea.vmem [#allocation4], %s590_s8  ;;  %s194_s21 = scalar_lea.hbm %s951_s1, %s591_s10 }
  0x17   : > { %s198_s12 = sshll.u32 %s188_s11, 4  ;;  %s196_s22 = sshll.u32 %s194_s21, 4  ;;  %s199_s12 = int_to_ptr.vmem [resolvable:$true] %s198_s12  ;;  %s197_s22 = int_to_ptr.hbm [resolvable:$true] %s196_s22 }
  0x18   : > { %s185_s26 = scalar_lea.sflag [#allocation5], %s162_s25  ;;  %207 = sbr.rel (%p204_p12) target bundleno = 304 (0x130), region = 28 }
  0x19   : > { %612 = dma.hbm_to_vmem [thread:$0]  (!%p864_p9), %s197_s22, 32, %s199_s12, %s185_s26  }
  0x1a   : > { %s209_s27 = sand.u32 (!%p204_p12), 1, %s767_s13  }
  0x1b   : > { %s593_s28 = sshll.u32 (!%p204_p12), %s209_s27, 3  ;;  %s210_s29 = scalar_lea.sflag (!%p204_p12), [#allocation3], %s209_s27 }
  0x1c   : > { %s213_s30 = scalar_lea.vmem (!%p204_p12), [#allocation2], %s593_s28 }
  0x1d   : > { %754 = dma.done.wait (%p849_p7), %s210_s29, 128  }
  0x1e   : > { %756 = vsyncadd (%p849_p7), %s210_s29, 4294967168  ;;  %s594_s4 = sshll.u32 %s209_s27, 1  ;;  %s220_s5 = scalar_lea.sflag [#allocation5], %s209_s27 }
  0x1f   : > { %s223_s6 = scalar_lea.vmem [#allocation4], %s594_s4 }
  0x20   : > { %758 = dma.done.wait (%p849_p7), %s220_s5, 32  }
  0x21   : > { %760 = vsyncadd (%p849_p7), %s220_s5, 4294967264  ;;  %v887_v0 = vld [vmem:[%s213_s30] sm:$0xff]  ;;  %v890_v1 = vld [vmem:[%s223_s6] sm:$0x3]  ;;  %vm281_vm1 = vcmask 1043456   ;;  %vm392_vm2 = vcmask 1040384   ;;  %v330_v34 = vlaneseq }
  0x22   : > { %276 = vst [vmem:[#allocation1] ss:$2 sm:$0xff] %v887_v0  ;;  %vm388_vm0 = vcmp.ne.s32.totalorder %v890_v1, 4294967196  ;;  %v785_v2 = vmov 0   ;;  %v332_v40 = vperm.slane %v890_v1, 0  ;;  %v333_v41 = vperm.slane %v890_v1, 1 }
  0x23   : > { %v416_v3 = vsel %vm388_vm0, 1, %v785_v2  ;;  %v331_v37 = vshrl.u32 %v330_v34, 7  ;;  %p261_p13 = scmp.lt.s32.totalorder %s775_s15, 1  ;;  %vm414_vm5 = vcmask 0  }
  0x24   : > { %v417_v4 = vperm.slane %v416_v3, 0  ;;  %v418_v5 = vperm.slane %v416_v3, 1 }
  0x25   : > { %vm334_vm3 = vcmp.eq.s32.totalorder %v331_v37, %v332_v40  ;;  %vm335_vm4 = vcmp.eq.s32.totalorder %v331_v37, %v333_v41  ;;  %s965_s15 = smov (!%p261_p13, %s775_s15), 1 }
  0x26   : > { %v419_v10 = vsel %vm392_vm2, %v417_v4, 0  ;;  %v420_v11 = vsel %vm392_vm2, %v418_v5, 0  ;;  %s266_s7 = scalar_lea.vmem %s952_s2, %s965_s15  ;;  %s272_s11 = scalar_lea.vmem %s953_s3, %s965_s15 }
  0x27   : > { %v421_v14 = vadd.s32 %v420_v11, %v419_v10 }
  0x29   : > { %v277_v6 = vld.sshfl [vmem:[#allocation1] sm:$0xff pattern:$0x75316420]  ;;  %v278_v7 = vld.sshfl [vmem:[#allocation1 + $0x8] sm:$0xff pattern:$0x75316420] }
  0x2a   : > { %v282_v8 = vsel %vm281_vm1, %v277_v6, -inf  ;;  %v289_v9 = vsel %vm281_vm1, %v278_v7, -inf  ;;  %v423_v17 = vshrl.u32 %v421_v14, 16  ;;  %v422_v29 = vand.u32 65535, %v421_v14 }
  0x2b   : > { %v283_v12 = vrot.slane %v282_v8, 4  ;;  %v290_v13 = vrot.slane %v289_v9, 4 }
  0x2c   : > { %v425_v20 = vcvt.s32.f32 %v423_v17  ;;  %v424_v31 = vcvt.s32.f32 %v422_v29 }
  0x2d   : > { %v284_v15 = vmax.f32 %v282_v8, %v283_v12  ;;  %v291_v16 = vmax.f32 %v289_v9, %v290_v13 }
  0x2e   : > { %428 = vadd.xlane.f32.xlu0 %v425_v20 }
  0x2f   : > { %v285_v18 = vrot.slane %v284_v15, 2  ;;  %v292_v19 = vrot.slane %v291_v16, 2 }
  0x31   : > { %v286_v21 = vmax.f32 %v284_v15, %v285_v18  ;;  %v293_v22 = vmax.f32 %v291_v16, %v292_v19 }
  0x33   : > { %v287_v23 = vrot.slane %v286_v21, 1  ;;  %v294_v24 = vrot.slane %v293_v22, 1 }
  0x35   : > { %v899_v25 = vmax.f32 %v286_v21, %v287_v23  ;;  %v901_v26 = vmax.f32 %v293_v22, %v294_v24 }
  0x36   : > { %426 = vadd.xlane.f32.xlu0 %v424_v31 }
  0x37   : > { %v298_v27 = vrot.slane %v901_v26, 4 }
  0x39   : > { %v299_v28 = vsel %vm281_vm1, %v899_v25, %v298_v27 }
  0x3a   : > { %v301_v30 = vsub.f32 %v887_v0, %v299_v28 }
  0x3c   : > { %v302_v32 = vmul.f32 1.442695, %v301_v30 }
  0x3e   : > { %663 = vpow2.f32 %v302_v32 }
  0x44   : > { %v664_v33 = vpop.eup %663 }
  0x45   : > { %305 = vst [vmem:[#allocation1] ss:$2 sm:$0xff] %v664_v33 }
  0x4c   : > { %v306_v35 = vld.sshfl [vmem:[#allocation1] sm:$0xff pattern:$0x75316420]  ;;  %v307_v36 = vld.sshfl [vmem:[#allocation1 + $0x8] sm:$0xff pattern:$0x75316420] }
  0x4d   : > { %336 = vst [vmem:[#allocation1] ss:$2 sm:$0xff] %v887_v0  ;;  %v310_v38 = vsel %vm281_vm1, %v306_v35, 0.0  ;;  %v317_v39 = vsel %vm281_vm1, %v307_v36, 0.0 }
  0x4e   : > { %v311_v42 = vrot.slane %v310_v38, 4  ;;  %v318_v43 = vrot.slane %v317_v39, 4 }
  0x50   : > { %v312_v44 = vadd.f32 %v311_v42, %v310_v38  ;;  %v319_v45 = vadd.f32 %v318_v43, %v317_v39 }
  0x52   : > { %v313_v46 = vrot.slane %v312_v44, 2  ;;  %v320_v47 = vrot.slane %v319_v45, 2 }
  0x54   : > { %v337_v48 = vld.sshfl [vmem:[#allocation1] sm:$0xff pattern:$0x75316420]  ;;  %v338_v49 = vld.sshfl [vmem:[#allocation1 + $0x8] sm:$0xff pattern:$0x75316420]  ;;  %v314_v50 = vadd.f32 %v313_v46, %v312_v44  ;;  %v321_v51 = vadd.f32 %v320_v47, %v319_v45 }
  0x55   : > { %v341_v52 = vsel %vm334_vm3, %v337_v48, 0.0  ;;  %v342_v53 = vsel %vm335_vm4, %v338_v49, 0.0  ;;  %357 = vst [vmem:[#allocation1] ss:$2 sm:$0xff] %v887_v0 }
  0x56   : > { %v343_v54 = vsel %vm281_vm1, %v341_v52, 0.0  ;;  %v350_v55 = vsel %vm281_vm1, %v342_v53, 0.0  ;;  %v315_v56 = vrot.slane %v314_v50, 1  ;;  %v322_v57 = vrot.slane %v321_v51, 1 }
  0x57   : > { %v344_v58 = vrot.slane %v343_v54, 4  ;;  %v351_v59 = vrot.slane %v350_v55, 4 }
  0x58   : > { %v316_v60 = vadd.f32 %v315_v56, %v314_v50  ;;  %v323_v61 = vadd.f32 %v322_v57, %v321_v51 }
  0x59   : > { %v345_v62 = vadd.f32 %v344_v58, %v343_v54  ;;  %v352_v63 = vadd.f32 %v351_v59, %v350_v55 }
  0x5a   : > { %665 = vlog2.f32 %v316_v60 }
  0x5b   : > { %667 = vlog2.f32 %v323_v61  ;;  %v346_v2 = vrot.slane %v345_v62, 2  ;;  %v353_v3 = vrot.slane %v352_v63, 2 }
  0x5c   : > { %v358_v4 = vld.sshfl [vmem:[#allocation1] sm:$0xff pattern:$0x75316420]  ;;  %v359_v5 = vld.sshfl [vmem:[#allocation1 + $0x8] sm:$0xff pattern:$0x75316420] }
  0x5d   : > { %v347_v6 = vadd.f32 %v346_v2, %v345_v62  ;;  %v354_v0 = vadd.f32 %v353_v3, %v352_v63  ;;  %v362_v7 = vsel %vm281_vm1, %v358_v4, 0.0  ;;  %v369_v8 = vsel %vm281_vm1, %v359_v5, 0.0 }
  0x5e   : > { %v363_v9 = vrot.slane %v362_v7, 4  ;;  %v370_v10 = vrot.slane %v369_v8, 4 }
  0x5f   : > { %v348_v11 = vrot.slane %v347_v6, 1  ;;  %v355_v12 = vrot.slane %v354_v0, 1 }
  0x60   : > { %v666_v13 = vpop.eup %665  ;;  %v364_v14 = vadd.f32 %v363_v9, %v362_v7  ;;  %v371_v15 = vadd.f32 %v370_v10, %v369_v8 }
  0x61   : > { %v668_v16 = vpop.eup %667  ;;  %v325_v17 = vmul.f32 0.6931472, %v666_v13  ;;  %v349_v21 = vadd.f32 %v348_v11, %v347_v6  ;;  %v356_v22 = vadd.f32 %v355_v12, %v354_v0 }
  0x62   : > { %v327_v18 = vmul.f32 0.6931472, %v668_v16  ;;  %v365_v19 = vrot.slane %v364_v14, 2  ;;  %v372_v20 = vrot.slane %v371_v15, 2 }
  0x63   : > { %v328_v23 = vadd.f32 %v325_v17, %v899_v25 }
  0x64   : > { %v329_v24 = vadd.f32 %v327_v18, %v901_v26  ;;  %v366_v27 = vadd.f32 %v365_v19, %v364_v14  ;;  %v373_v28 = vadd.f32 %v372_v20, %v371_v15 }
  0x65   : > { %v376_v33 = vsub.f32 %v328_v23, %v349_v21 }
  0x66   : > { %v367_v29 = vrot.slane %v366_v27, 1  ;;  %v374_v30 = vrot.slane %v373_v28, 1  ;;  %v377_v34 = vsub.f32 %v329_v24, %v356_v22 }
  0x67   : > { %v382_v39 = vmul.f32 0.9, %v376_v33 }
  0x68   : > { %v368_v31 = vadd.f32 %v367_v29, %v366_v27  ;;  %v375_v32 = vadd.f32 %v374_v30, %v373_v28  ;;  %v383_v40 = vmul.f32 0.9, %v377_v34 }
  0x6a   : > { %v378_v35 = vmul.f32 0.25, %v368_v31  ;;  %v379_v36 = vmul.f32 0.25, %v375_v32 }
  0x6c   : > { %v380_v37 = vsub.f32 %v328_v23, %v378_v35  ;;  %v381_v38 = vsub.f32 %v329_v24, %v379_v36 }
  0x6e   : > { %v384_v41 = vmul.f32 0.1, %v380_v37  ;;  %v385_v42 = vmul.f32 0.1, %v381_v38 }
  0x70   : > { %v386_v43 = vadd.f32 %v384_v41, %v382_v39  ;;  %v387_v25 = vadd.f32 %v385_v42, %v383_v40 }
  0x72   : > { %v391_v44 = vrot.slane %v387_v25, 7 }
  0x74   : > { %v393_v26 = vsel %vm392_vm2, %v386_v43, %v391_v44 }
  0x75   : > { %v395_v45 = vsel %vm388_vm0, %v393_v26, 0.0 }
  0x76   : > { %v397_v46 = vperm.slane %v395_v45, 0  ;;  %v398_v47 = vperm.slane %v395_v45, 1 }
  0x78   : > { %v401_v48 = vsel %vm392_vm2, %v397_v46, 0.0  ;;  %v402_v49 = vsel %vm392_vm2, %v398_v47, 0.0 }
  0x79   : > { %v403_v50 = vadd.f32 %v402_v49, %v401_v48 }
  0x7b   : > { %404 = vadd.xlane.f32.xlu1 %v403_v50 }
  0xa1   : > { %v429_v51 = vpop.xlane.xlu0 %428 }
  0xa2   : > { %v431_v52 = vcvt.f32.s32 %v429_v51 }
  0xa4   : > { %v432_v54 = vshll.u32 %v431_v52, 16 }
  0xa9   : > { %v427_v53 = vpop.xlane.xlu0 %426 }
  0xaa   : > { %v430_v55 = vcvt.f32.s32 %v427_v53 }
  0xac   : > { %v433_v56 = vadd.s32 %v432_v54, %v430_v55 }
  0xae   : > { %v434_v57 = vrot.slane %v433_v56, 4 }
  0xb0   : > { %v435_v58 = vadd.s32 %v434_v57, %v433_v56 }
  0xb2   : > { %v436_v59 = vrot.slane %v435_v58, 2 }
  0xb4   : > { %v437_v62 = vadd.s32 %v436_v59, %v435_v58 }
  0xb6   : > { %v438_v3 = vrot.slane %v437_v62, 1 }
  0xb8   : > { %v439_v6 = vadd.s32 %v438_v3, %v437_v62 }
  0xee   : > { %v405_v1 = vpop.xlane.xlu1 %404 }
  0xef   : > { %v406_v60 = vrot.slane %v405_v1, 4 }
  0xf1   : > { %v407_v61 = vadd.f32 %v406_v60, %v405_v1 }
  0xf3   : > { %v408_v63 = vrot.slane %v407_v61, 2 }
  0xf5   : > { %v409_v2 = vadd.f32 %v408_v63, %v407_v61 }
  0xf7   : > { %v410_v4 = vrot.slane %v409_v2, 1 }
  0xf9   : > { %v411_v5 = vadd.f32 %v410_v4, %v409_v2 }
  0xfb   : > { %598 = vpush %v411_v5 }
  0xfc   : > { %600 = vpush %v439_v6 }
 0x12c   : > { %s599_s8 = spop %598 }
 0x12d   : > { %v413_v0 = vstv %s599_s8  ;;  %s601_s12 = spop %600 }
 0x12e   : > { %415 = vst.msk [vmem:[%s266_s7] sm:$0x1] %vm414_vm5, %v413_v0  ;;  %v441_v7 = vstv %s601_s12 }
 0x12f   : > { %442 = vst.msk [vmem:[%s272_s11] sm:$0x1] %vm414_vm5, %v441_v7 }
 0x130 PF: > { %s20_s17 = sadd.s32 1, %s783_s17   ;;  %s957_s12 = smov %s767_s13 }
 0x131   : > { %p17_p0 = scmp.ge.s32.totalorder %s20_s17, 4   ;;  %s958_s13 = smov %s771_s14 }
 0x132   : > { %s959_s14 = smov %s855_s24  ;;  %s960_s15 = smov %s779_s16 }
 0x133   : > { %s961_s16 = smov %s963_s19  ;;  %19 = sbr.rel (!%p17_p0) target bundleno = 6 (0x6), region = 93 }
 0x138   :  { %484 = vsyncpa [#allocation3], 1 }
 0x139   :  { %486 = vsyncpa [#allocation3 + $0x1], 1 }
 0x13a   :  { %487 = vsyncpa [#allocation5], 1 }
 0x13b   :  { %489 = vsyncpa [#allocation5 + $0x1], 1 }

</bundles_post_ra>
